<compile_context>
chip_gen: v7x
topology: tpu7x:2x2x1
jax: 0.10.0
libtpu: 0.0.40
codegen_flags: <defaults>
</compile_context>

<pallas_src>
import functools
import math

import jax
import jax.numpy as jnp
from jax.experimental import pallas as pl
from jax.experimental.pallas import tpu as pltpu


def _round_up(a: int, b: int) -> int:
    return -(-a // b) * b


def _sublane_multiple(dtype) -> int:
    # Native TPU tiles: (8,128) for 32-bit, (16,128) for 16-bit, (32,128) for 8-bit.
    return {4: 8, 2: 16, 1: 32}.get(jnp.dtype(dtype).itemsize, 8)


def _spatial_dropout1d_kernel(x_ref, keep_ref, o_ref, *, C: int, TC: int,
                              chunk_lanes: int, row_group: int, rows: int):
    """x_ref/o_ref: (rows, T*C) lane-dense blocks.  keep_ref: (rows, C).

    keep_ref already holds 0.0 (dropped channel) or 1/(1-p) (kept channel) in
    the output dtype.  The block is streamed in (row_group, chunk_lanes)
    pieces; the channel mask is expanded only to `chunk_lanes` lanes per row
    group (a few vregs), so no block-sized intermediate hits VMEM.
    chunk_lanes % C == 0, so every lane chunk starts at a channel boundary and
    the same expanded mask is reused for all chunks of a row group.
    """
    reps = chunk_lanes // C
    n_full_chunks = TC // chunk_lanes
    rem_lanes = TC - n_full_chunks * chunk_lanes

    def mul_rows(row_start: int, nrows: int):
        rs = pl.ds(row_start, nrows)
        keep_g = jnp.tile(keep_ref[rs, :], (1, reps))      # (nrows, chunk_lanes)
        for k in range(n_full_chunks):
            cs = pl.ds(k * chunk_lanes, chunk_lanes)
            o_ref[rs, cs] = x_ref[rs, cs] * keep_g
        if rem_lanes:
            cs = pl.ds(n_full_chunks * chunk_lanes, rem_lanes)
            o_ref[rs, cs] = x_ref[rs, cs] * keep_g[:, :rem_lanes]

    n_groups = rows // row_group
    for g in range(n_groups):                 # static, bounded by MAX_GROUPS
        mul_rows(g * row_group, row_group)
    rem_rows = rows - n_groups * row_group
    if rem_rows:
        mul_rows(n_groups * row_group, rem_rows)


def _channel_keep_mask(key, batch: int, channels: int, p: float, dtype):
    """(B, C) array of 0.0 (drop) or 1/(1-p) (keep), one value per channel.

    The scale is cast to `dtype` before use (matches PyTorch's in-dtype
    scaling for bf16).
    """
    if p >= 1.0:
        return jnp.zeros((batch, channels), dtype)
    keep = jax.random.bernoulli(key, 1.0 - p, (batch, channels))
    scale = jnp.float32(1.0 / (1.0 - p))
    return (keep.astype(jnp.float32) * scale).astype(dtype)


def spatial_dropout1d(x: jax.Array, p: float, key: jax.Array, *,
                      training: bool = True,
                      target_block_bytes: int = 8 * 1024 * 1024,
                      min_pallas_bytes: int = 1 * 1024 * 1024,
                      donate_x: bool = False) -> jax.Array:
    """x: (B, T, C).  Equivalent to dropout1d(x.permute(0,2,1)).permute(0,2,1)."""
    B, T, C = x.shape
    if (not training) or p <= 0.0:
        return x  # nn.Dropout1d is the identity in eval mode / p == 0.

    keep = _channel_keep_mask(key, B, C, float(p), x.dtype)   # (B, C)
    itemsize = jnp.dtype(x.dtype).itemsize
    TC = T * C

    # Small-tensor fast path: fixed pallas_call launch/pipeline cost dominates
    # below ~1 MiB; a fused XLA broadcast-multiply is as fast or faster there.
    if B * TC * itemsize < min_pallas_bytes:
        return x * keep[:, None, :]

    # Row-major (B, T, C) -> (B, T*C): merges contiguous minor dims -> lane-dense.
    x2 = x.reshape(B, TC)

    # ---- block-row sizing ---------------------------------------------------
    sub = _sublane_multiple(x.dtype)          # dtype-aware sublane multiple
    row_bytes = TC * itemsize
    rows = max(1, target_block_bytes // max(1, row_bytes))
    # Guarantee >= 2 grid steps when the batch allows it, so both v7x
    # TensorCores get work under dimension_semantics=("parallel",).
    if B >= 2 * sub:
        rows = min(rows, _round_up(-(-B // 2), sub))
    if rows >= B:
        rows = B                               # single block: full second-minor dim
    else:
        rows = (rows // sub) * sub             # partial blocks must be sublane multiples
        if rows == 0:
            rows = min(B, sub)

    # ---- in-kernel streaming granularity -------------------------------------
    MAX_CHUNKS = 64    # bound on the unrolled lane-chunk loop
    MAX_GROUPS = 16    # soft bound on the unrolled row-group loop
    lcm_cl = math.lcm(C, 128)
    # TODO(synk): for channel counts with a huge lcm(C,128) (e.g. C=1000) the
    # per-group mask expansion gets large; a per-row loop would be better there.
    chunk_lanes = lcm_cl * max(1, -(-TC // (lcm_cl * MAX_CHUNKS)))
    # Keep the per-group mask expansion (row_group x chunk_lanes) to ~<= 64 KiB.
    max_rg = max(sub, (((64 * 1024) // (chunk_lanes * itemsize)) // sub) * sub)
    row_group = min(rows, 8 * sub, max_rg)
    row_group = max(row_group, -(-rows // MAX_GROUPS))
    if row_group >= sub:
        row_group = (row_group // sub) * sub
    row_group = max(1, min(row_group, rows))

    # ---- VMEM budget / scheduler hints ---------------------------------------
    in_block = rows * TC * itemsize
    keep_block = rows * C * itemsize
    # double-buffered in + out + keep blocks, plus slack for internal scratch.
    vmem_limit = 2 * (2 * in_block + keep_block) + 8 * 1024 * 1024
    vmem_limit = int(max(32 * 1024 * 1024, vmem_limit))

    cost = pl.CostEstimate(
        flops=B * TC,
        transcendentals=0,
        bytes_accessed=(2 * B * TC + B * C) * itemsize,
    )

    kernel = functools.partial(
        _spatial_dropout1d_kernel,
        C=C, TC=TC, chunk_lanes=chunk_lanes, row_group=row_group, rows=rows)

    y2 = pl.pallas_call(
        kernel,
        out_shape=jax.ShapeDtypeStruct((B, TC), x.dtype),
        grid=(pl.cdiv(B, rows),),
        in_specs=[
            pl.BlockSpec((rows, TC), lambda i: (i, 0)),   # data block (lane-dense)
            pl.BlockSpec((rows, C), lambda i: (i, 0)),    # per-channel keep/scale
        ],
        out_specs=pl.BlockSpec((rows, TC), lambda i: (i, 0)),
        compiler_params=pltpu.CompilerParams(
            # Blocks are fully independent -> shard grid across TensorCores.
            dimension_semantics=("parallel",),
            vmem_limit_bytes=vmem_limit,
        ),
        cost_estimate=cost,
        input_output_aliases=({0: 0} if donate_x else {}),
    )(x2, keep)

    return y2.reshape(B, T, C)


if __name__ == "__main__":
    root = jax.random.PRNGKey(0)

    def check(x, y, keep, p, tol):
        assert y.shape == x.shape and y.dtype == x.dtype
        y32 = y.astype(jnp.float32)
        x32 = x.astype(jnp.float32)
        y_ref = x32 * keep.astype(jnp.float32)[:, None, :]
        assert bool(jnp.allclose(y32, y_ref, rtol=tol, atol=tol)), "mismatch vs reference"
        # Structural Dropout1d property: every (b, :, c) channel is either
        # all-zero or uniformly scaled by 1/(1-p).
        scale = 1.0 / (1.0 - p)
        dropped = jnp.all(y32 == 0.0, axis=1)                           # (B, C)
        kept_ok = jnp.all(
            jnp.abs(y32 - x32 * scale) <= tol * (jnp.abs(x32 * scale) + 1.0), axis=1)
        assert bool(jnp.all(dropped | kept_ok)), "channel not uniformly scaled"

    # Case 1: tiny DDNet-like shape, forced through the Pallas path (grid=(1,)).
    k1, k2 = jax.random.split(root)
    B, T, C, p = 2, 8, 32, 0.5
    x = jax.random.normal(k1, (B, T, C), dtype=jnp.float32)
    keep = _channel_keep_mask(k2, B, C, p, x.dtype)
    y = jax.block_until_ready(spatial_dropout1d(x, p, k2, min_pallas_bytes=0))
    check(x, y, keep, p, 1e-6)

    # Case 2: multi-block grid with an overhanging (padded) last block, f32.
    k3, k4 = jax.random.split(k1)
    B, T, C, p = 20, 16, 32, 0.3
    x = jax.random.normal(k3, (B, T, C), dtype=jnp.float32)
    keep = _channel_keep_mask(k4, B, C, p, x.dtype)
    y = jax.block_until_ready(
        spatial_dropout1d(x, p, k4, min_pallas_bytes=0, target_block_bytes=8192))
    check(x, y, keep, p, 1e-6)

    # Case 3: bf16 (16-row sublane rounding) with a padded last block.
    k5, k6 = jax.random.split(k3)
    B, T, C, p = 20, 16, 32, 0.5
    xb = jax.random.normal(k5, (B, T, C), dtype=jnp.bfloat16)
    keepb = _channel_keep_mask(k6, B, C, p, xb.dtype)
    yb = jax.block_until_ready(
        spatial_dropout1d(xb, p, k6, min_pallas_bytes=0, target_block_bytes=8192))
    check(xb, yb, keepb, p, 2e-2)

    # Eval mode is the identity; tiny tensors take the fused-XLA fast path and
    # must agree with the Pallas path for the same key.
    assert bool(jnp.all(spatial_dropout1d(xb, p, k6, training=False) == xb))
    yb_fast = jax.block_until_ready(spatial_dropout1d(xb, p, k6))  # fast path
    assert bool(jnp.allclose(yb_fast.astype(jnp.float32), yb.astype(jnp.float32),
                             rtol=2e-2, atol=2e-2))

    print("KERNEL_OK")
</pallas_src>

<mosaic_0001>
module attributes {stable_mosaic.version = 11 : i64} {
  func.func @_spatial_dropout1d_kernel(%arg0: i32, %arg1: memref<2x256xf32, #tpu.memory_space<vmem>>, %arg2: memref<2x32xf32, #tpu.memory_space<vmem>>, %arg3: memref<2x256xf32, #tpu.memory_space<vmem>>) attributes {dimension_semantics = [#tpu.dimension_semantics<parallel>], iteration_bounds = array<i64: 1>, scalar_prefetch = 0 : i64, scratch_operands = 0 : i64, tpu.core_type = #tpu.core_type<tc>, window_params = [{transform_indices = @transform_0, window_bounds = array<i64: 2, 256>}, {transform_indices = @transform_1, window_bounds = array<i64: 2, 32>}, {transform_indices = @transform_2, window_bounds = array<i64: 2, 256>}]} {
    %c0 = arith.constant 0 : index
    %c0_0 = arith.constant 0 : index
    %0 = vector.load %arg2[%c0, %c0_0] : memref<2x32xf32, #tpu.memory_space<vmem>>, vector<2x32xf32>
    %1 = tpu.concatenate %0, %0, %0, %0 in 1 : vector<2x32xf32>, vector<2x32xf32>, vector<2x32xf32>, vector<2x32xf32> -> vector<2x128xf32>
    %c0_1 = arith.constant 0 : index
    %c0_2 = arith.constant 0 : index
    %2 = vector.load %arg1[%c0_1, %c0_2] : memref<2x256xf32, #tpu.memory_space<vmem>>, vector<2x128xf32>
    %3 = arith.mulf %2, %1 : vector<2x128xf32>
    %c0_3 = arith.constant 0 : index
    %c0_4 = arith.constant 0 : index
    %4 = vector.load %arg3[%c0_3, %c0_4] : memref<2x256xf32, #tpu.memory_space<vmem>>, vector<2x128xf32>
    tpu.vector_store %arg3[%c0_3, %c0_4], %3 {strides = array<i32>} : memref<2x256xf32, #tpu.memory_space<vmem>>, vector<2x128xf32>,
    %c0_5 = arith.constant 0 : index
    %c128 = arith.constant 128 : index
    %5 = vector.load %arg1[%c0_5, %c128] : memref<2x256xf32, #tpu.memory_space<vmem>>, vector<2x128xf32>
    %6 = arith.mulf %5, %1 : vector<2x128xf32>
    %c0_6 = arith.constant 0 : index
    %c128_7 = arith.constant 128 : index
    %7 = vector.load %arg3[%c0_6, %c128_7] : memref<2x256xf32, #tpu.memory_space<vmem>>, vector<2x128xf32>
    tpu.vector_store %arg3[%c0_6, %c128_7], %6 {strides = array<i32>} : memref<2x256xf32, #tpu.memory_space<vmem>>, vector<2x128xf32>,
    return
  }
  func.func @transform_0(%arg0: i32) -> (i32, i32) {
    %c0_i32 = arith.constant 0 : i32
    %c0_i32_0 = arith.constant 0 : i32
    return %arg0, %c0_i32 : i32, i32
  }
  func.func @transform_1(%arg0: i32) -> (i32, i32) {
    %c0_i32 = arith.constant 0 : i32
    %c0_i32_0 = arith.constant 0 : i32
    return %arg0, %c0_i32 : i32, i32
  }
  func.func @transform_2(%arg0: i32) -> (i32, i32) {
    %c0_i32 = arith.constant 0 : i32
    %c0_i32_0 = arith.constant 0 : i32
    return %arg0, %c0_i32 : i32, i32
  }
}

</mosaic_0001>

<bundles_post_ra>
// kernel: tpu_custom_call.1
= control target key start
LH: loop header
LB: loop body
LE: loop exit
PB: predicated region body
PF: predicated region fallthrough
CT: control target
= control target key end

     0   :  { %7 = vsyncpa [#allocation3], 0  ;;  %s162_s0 = inlined_call_operand.hbm [shape: f32[2,256], index: 0, kind: input, shape index: {}]   ;;  %s163_s1 = inlined_call_operand.vmem [shape: f32[2,32], index: 1, kind: input, shape index: {}]   ;;  %s164_s2 = inlined_call_operand.hbm [shape: f32[2,256], index: 2, kind: output, shape index: {}]  }
   0x1   :  { %8 = vsyncpa [#allocation4], 0  ;;  %s115_s9 = smov [#allocation2]   ;;  %s67_s13 = scalar_lea.hbm %s162_s0, 64 }
   0x2   :  { %s15_s10 = sshll.u32 %s115_s9, 4  ;;  %p68_p0 = scmp.ne.s32.totalorder %s162_s0, %s67_s13  ;;  %s16_s10 = int_to_ptr.vmem [resolvable:$true] %s15_s10 }
   0x3   :  { %p71_p1 = scmp.lt.u32.totalorder %s67_s13, %s162_s0 }
   0x5   :  { %p73_p2 = pnand %p71_p1, %p68_p0 }
   0x7   :  { %76 = shalt.err (!%p73_p2)
}
   0x8   :  { %s77_s18 = scalar_lea.vmem %s16_s10, 64  ;;  %p82_p4 = scmp.lt.s32.totalorder %s16_s10, %s16_s10 }
   0x9   :  { %p78_p3 = scmp.ne.s32.totalorder %s16_s10, %s77_s18  ;;  %p83_p5 = scmp.lt.s32.totalorder %s77_s18, %s77_s18 }
   0xb   :  { %p84_p6 = por %p83_p5, %p82_p4 }
   0xd   :  { %p85_p7 = pnand %p84_p6, %p78_p3 }
   0xf   :  { %88 = shalt.err (!%p85_p7)
}
  0x10   :  { %18 = dma.hbm_to_vmem [thread:$0]  %s162_s0, 64, %s16_s10, [#allocation3]  }
  0x11   :  { %111 = dma.done.wait [#allocation3], 64  }
  0x12   :  { %112 = vsyncadd [#allocation3], 4294967232  ;;  %v24_v0 = vld [vmem:[%s163_s1] sm:$0x3]  ;;  %s116_s23 = smov 32   ;;  %s117_s24 = smov 96  }
  0x13   :  { %26 = vrot.lane.b32.xlu0 %v24_v0, %s116_s23  ;;  %32 = vrot.lane.b32.xlu1 %v24_v0, %s117_s24  ;;  %s118_s25 = smov 64   ;;  %vm35_vm0 = vcmask 261120   ;;  %vm37_vm1 = vcmask 523264   ;;  %vm39_vm2 = vcmask 785408   ;;  %v41_v5 = vld [vmem:[#allocation2] sm:$0x3] }
  0x14   :  { %v44_v6 = vld [vmem:[#allocation2 + $0x2] sm:$0x3]  ;;  %s119_s0 = smov [#allocation5]  }
  0x15   :  { %s53_s26 = sshll.u32 %s119_s0, 4  ;;  %s54_s26 = int_to_ptr.vmem [resolvable:$true] %s53_s26 }
  0x16   :  { %s89_s1 = scalar_lea.vmem %s54_s26, 64  ;;  %p94_p9 = scmp.lt.s32.totalorder %s54_s26, %s54_s26 }
  0x17   :  { %29 = vrot.lane.b32.xlu0 %v24_v0, %s118_s25  ;;  %p90_p8 = scmp.ne.s32.totalorder %s54_s26, %s89_s1  ;;  %p95_p10 = scmp.lt.s32.totalorder %s89_s1, %s89_s1 }
  0x19   :  { %p96_p11 = por %p95_p10, %p94_p9 }
  0x1b   :  { %p97_p12 = pnand %p96_p11, %p90_p8 }
  0x85   :  { %v27_v1 = vpop.permute.xlu0 %26  ;;  %v33_v2 = vpop.permute.xlu1 %32 }
  0x86   :  { %v36_v3 = vsel %vm35_vm0, %v24_v0, %v27_v1 }
  0x89   :  { %v30_v4 = vpop.permute.xlu0 %29 }
  0x8a   :  { %v38_v7 = vsel %vm37_vm1, %v36_v3, %v30_v4 }
  0x8b   :  { %v40_v8 = vsel %vm39_vm2, %v38_v7, %v33_v2 }
  0x8c   :  { %v42_v9 = vmul.f32 %v41_v5, %v40_v8  ;;  %v45_v10 = vmul.f32 %v44_v6, %v40_v8 }
  0x8e   :  { %43 = vst [vmem:[#allocation5] sm:$0x3] %v42_v9  ;;  %46 = vst [vmem:[#allocation5 + $0x2] sm:$0x3] %v45_v10 }
  0x8f   :  { %100 = shalt.err (!%p97_p12)
}
  0x90   :  { %s101_s29 = scalar_lea.hbm %s164_s2, 64 }
  0x91   :  { %p102_p13 = scmp.ne.s32.totalorder %s164_s2, %s101_s29  ;;  %p105_p0 = scmp.lt.u32.totalorder %s101_s29, %s164_s2 }
  0x93   :  { %p107_p1 = pnand %p105_p0, %p102_p13 }
  0x95   :  { %110 = shalt.err (!%p107_p1)
}
  0x96   :  { %56 = dma.vmem_to_hbm [thread:$0]  %s54_s26, 64, %s164_s2, [#allocation4]  }
  0x97   :  { %113 = dma.done.wait [#allocation4], 64  }
  0x98   :  { %114 = vsyncadd [#allocation4], 4294967232 }
  0x99   :  { %60 = vsyncpa [#allocation3], 1 }
  0x9a   :  { %61 = vsyncpa [#allocation4], 1 }

</bundles_post_ra>
